<compile_context>
chip_gen: v6e
topology: v6e:2x2x1
jax: 0.10.0
libtpu: 0.0.40
codegen_flags: <defaults>
</compile_context>

<pallas_src>
import functools
import math

import jax
import jax.numpy as jnp
from jax.experimental import pallas as pl
from jax.experimental.pallas import tpu as pltpu


def _round_up(a, b):
    return ((a + b - 1) // b) * b


_SQRT_2_OVER_PI = 0.7978845608028654
_GELU_C = 0.044715


def _gelu_tanh(y):
    """tanh-form GELU: 0.5*y*(1 + tanh(sqrt(2/pi)*(y + 0.044715*y^3))).

    tanh is EUP work (its own VLIW slot); the rest is a handful of VPU ops.
    Matches the exact erf GELU to ~5e-4 absolute over the relevant range.
    """
    inner = _SQRT_2_OVER_PI * (y + _GELU_C * (y * y * y))
    return 0.5 * y * (1.0 + jnp.tanh(inner))


def _mlp_kernel(x_ref, w_ref, b_ref, o_ref):
    # x_ref: (tile_m, F_pad)     w_ref: (F_pad, block_n)  (pre-transposed (in, out))
    # b_ref: (1, block_n)        o_ref: (tile_m, block_n)
    y = jnp.dot(x_ref[...], w_ref[...], preferred_element_type=jnp.float32)
    y = y + b_ref[...].astype(jnp.float32)
    y = _gelu_tanh(y)
    # Dropout(p=0.0) is an exact identity — nothing to do.
    o_ref[...] = y.astype(o_ref.dtype)


@functools.lru_cache(maxsize=1)
def _hw_config():
    """Generation-aware budgets. v5e/v6e: 128 MiB VMEM; v7x: 64 MiB, 2 TCs."""
    try:
        cap = int(getattr(pltpu.get_tpu_info(), "vmem_capacity_bytes", 0) or 0)
    except Exception:
        cap = 0
    if cap <= 0:
        cap = 64 * 1024 * 1024          # conservative (v7x-sized) default
    big_vmem = cap >= 100 * 1024 * 1024  # v5e / v6e
    vmem_limit = min(int(cap * 0.75), cap - 8 * 1024 * 1024)
    w_cap = (16 * 1024 * 1024) if big_vmem else (5 * 1024 * 1024)
    max_tile_m = 512 if big_vmem else 256
    prefer_two_steps = not big_vmem      # v7x shards 'parallel' axes over 2 TCs
    return vmem_limit, w_cap, max_tile_m, prefer_two_steps


def _pick_block_n(F_pad, itemsize, w_cap):
    """Largest multiple of 128 that divides F_pad with weight block <= w_cap."""
    # TODO(synk): add an inner 'arbitrary' K axis over F_pad with an f32 VMEM
    # accumulator (bias+GELU in a pl.when finalize) for F_pad so large that even
    # block_n=128 blows the per-block VMEM budget (relevant on v7x, F_pad >~ 10K f32).
    best = 128
    q = F_pad // 128
    for d in range(1, q + 1):
        if q % d == 0:
            bn = 128 * d
            if F_pad * bn * itemsize <= w_cap and bn > best:
                best = bn
    return best


def _pick_tile_m(M, F_pad, block_n, itemsize, max_tile_m, vmem_limit,
                 prefer_two_steps, grid_n):
    """Pick a 32-multiple row tile that fits VMEM and minimizes M padding."""
    budget = int(vmem_limit * 0.8)
    w_bytes = F_pad * block_n * itemsize           # weight block, single-buffered
    b_bytes = block_n * itemsize

    def fits(c):
        x_b = 2 * c * F_pad * itemsize             # double-buffered x block
        o_b = 2 * c * block_n * itemsize           # double-buffered out block
        return x_b + o_b + w_bytes + b_bytes <= budget

    cands = [c for c in range(32, max_tile_m + 1, 32) if fits(c)] or [32]
    pad = lambda c: _round_up(M, c) - M
    best = min(cands, key=lambda c: (pad(c), -c))

    if (prefer_two_steps and grid_n == 1 and best >= 64
            and _round_up(M, best) // best == 1):
        # Give v7x's second TensorCore work if it costs no extra padding.
        halves = [c for c in cands
                  if c <= (best + 1) // 2 and _round_up(M, c) <= _round_up(M, best)]
        if halves:
            best = min(halves, key=lambda c: (pad(c), -c))
    return best


@functools.partial(jax.jit, static_argnames=("tile_m", "block_n"))
def mlp_forward(x, w_io, b_row, *, tile_m=None, block_n=None):
    """x: (..., F); w_io: (F_pad, F_pad) pre-transposed+padded; b_row: (1, F_pad)."""
    orig_shape = x.shape
    orig_dtype = x.dtype
    F = orig_shape[-1]
    F_pad = w_io.shape[0]
    assert w_io.shape == (F_pad, F_pad) and b_row.shape == (1, F_pad) and F <= F_pad

    x2d = x.reshape(-1, F)
    M = x2d.shape[0]
    itemsize = jnp.dtype(w_io.dtype).itemsize

    vmem_limit, w_cap, max_tile_m, prefer_two = _hw_config()
    if block_n is None:
        block_n = _pick_block_n(F_pad, itemsize, w_cap)
    assert F_pad % block_n == 0, (F_pad, block_n)
    grid_n = F_pad // block_n
    if tile_m is None:
        tile_m = _pick_tile_m(M, F_pad, block_n, itemsize, max_tile_m,
                              vmem_limit, prefer_two, grid_n)
    M_pad = _round_up(M, tile_m)
    grid_m = M_pad // tile_m

    # Feed the MXU in the weights' dtype (bf16 weights -> bf16 x, f32 accumulate).
    x_p = x2d.astype(w_io.dtype) if x2d.dtype != w_io.dtype else x2d
    if (M_pad != M) or (F_pad != F):
        # TODO(synk): store activations pre-padded at F_pad (like the weights) and
        # pick M so M_pad == M, removing this pad and the final slice round trips.
        x_p = jnp.pad(x_p, ((0, M_pad - M), (0, F_pad - F)))

    out = pl.pallas_call(
        _mlp_kernel,
        out_shape=jax.ShapeDtypeStruct((M_pad, F_pad), orig_dtype),
        grid_spec=pltpu.PrefetchScalarGridSpec(
            num_scalar_prefetch=0,
            # j (output-feature block) outer so each weight block is fetched once
            # and held across all row tiles; i (row tiles) inner.
            grid=(grid_n, grid_m),
            in_specs=[
                pl.BlockSpec((tile_m, F_pad), lambda j, i: (i, 0)),
                pl.BlockSpec((F_pad, block_n), lambda j, i: (0, j),
                             pipeline_mode=pl.Buffered(1)),   # refetched once per j
                pl.BlockSpec((1, block_n), lambda j, i: (0, j),
                             pipeline_mode=pl.Buffered(1)),
            ],
            out_specs=pl.BlockSpec((tile_m, block_n), lambda j, i: (i, j)),
        ),
        compiler_params=pltpu.CompilerParams(
            dimension_semantics=("parallel", "parallel"),
            vmem_limit_bytes=vmem_limit),
    )(x_p, w_io, b_row)

    if (M_pad != M) or (F_pad != F):
        out = out[:M, :F]
    return out.reshape(orig_shape)


def init_mlp_params(key, in_features, dtype=jnp.float32):
    """nn.Linear-style init: uniform ±1/sqrt(fan_in); weight in PyTorch (out, in) layout."""
    kw, kb = jax.random.split(key)
    bound = 1.0 / math.sqrt(in_features)
    weight = jax.random.uniform(kw, (in_features, in_features), dtype,
                                minval=-bound, maxval=bound)  # (out, in)
    bias = jax.random.uniform(kb, (in_features,), dtype,
                              minval=-bound, maxval=bound)
    return weight, bias


def prepare_mlp_params(weight_oi, bias, dtype=None):
    """One-time prep (outside the forward path): optional cast (e.g. bf16 MXU path),
    transpose to (in, out) and pad feature axes to a lane-dense multiple of 128."""
    F = weight_oi.shape[0]
    F_pad = _round_up(max(F, 128), 128)
    w_io = jnp.asarray(weight_oi).T                                   # (in, out)
    b = jnp.asarray(bias)
    if dtype is not None:
        w_io = w_io.astype(dtype)
        b = b.astype(dtype)
    w_io = jnp.pad(w_io, ((0, F_pad - F), (0, F_pad - F)))
    b_row = jnp.pad(b, (0, F_pad - F)).reshape(1, F_pad)
    return w_io, b_row


if __name__ == "__main__":
    key = jax.random.PRNGKey(0)
    k_x, k_p = jax.random.split(key)

    batch, seq, in_features = 2, 8, 32          # small shapes implied by the module
    x = jax.random.normal(k_x, (batch, seq, in_features), dtype=jnp.float32)

    weight, bias = init_mlp_params(k_p, in_features)
    w_io, b_row = prepare_mlp_params(weight, bias)    # done once, outside jit

    out = mlp_forward(x, w_io, b_row)
    out = jax.block_until_ready(out)

    # Pure-JAX references.
    z = x @ weight.T + bias
    ref_tanh = jax.nn.gelu(z, approximate=True)    # same math as the kernel
    ref_erf = jax.nn.gelu(z, approximate=False)    # nn.GELU() default (exact)

    assert out.shape == x.shape
    err_tanh = float(jnp.max(jnp.abs(out - ref_tanh)))
    err_erf = float(jnp.max(jnp.abs(out - ref_erf)))
    assert err_tanh < 1e-3, err_tanh               # implementation parity
    assert err_erf < 5e-3, err_erf                 # module-semantics parity

    print("KERNEL_OK")
</pallas_src>

<mosaic_0001>
module attributes {stable_mosaic.version = 11 : i64} {
  func.func @_mlp_kernel(%arg0: i32, %arg1: i32, %arg2: memref<32x128xf32, #tpu.memory_space<vmem>>, %arg3: memref<128x128xf32, #tpu.memory_space<vmem>>, %arg4: memref<1x128xf32, #tpu.memory_space<vmem>>, %arg5: memref<32x128xf32, #tpu.memory_space<vmem>>) attributes {dimension_semantics = [#tpu.dimension_semantics<parallel>, #tpu.dimension_semantics<parallel>], iteration_bounds = array<i64: 1, 1>, scalar_prefetch = 0 : i64, scratch_operands = 0 : i64, tpu.core_type = #tpu.core_type<tc>, window_params = [{transform_indices = @transform_0, window_bounds = array<i64: 32, 128>}, {pipeline_mode = #tpu.pipeline_mode<synchronous>, transform_indices = @transform_1, window_bounds = array<i64: 128, 128>}, {pipeline_mode = #tpu.pipeline_mode<synchronous>, transform_indices = @transform_2, window_bounds = array<i64: 1, 128>}, {transform_indices = @transform_3, window_bounds = array<i64: 32, 128>}]} {
    %c0 = arith.constant 0 : index
    %c0_0 = arith.constant 0 : index
    %0 = vector.load %arg2[%c0, %c0_0] : memref<32x128xf32, #tpu.memory_space<vmem>>, vector<32x128xf32>
    %c0_1 = arith.constant 0 : index
    %c0_2 = arith.constant 0 : index
    %1 = vector.load %arg3[%c0_1, %c0_2] : memref<128x128xf32, #tpu.memory_space<vmem>>, vector<128x128xf32>
    %cst = arith.constant dense<0.000000e+00> : vector<32x128xf32>
    %2 = tpu.matmul %0, %1, %cst {dimension_numbers = #tpu.dot_dimension_numbers<[1], [0], [0], [1], [0, 0, 1, 1], [], []>} : vector<32x128xf32>, vector<128x128xf32>, vector<32x128xf32> -> vector<32x128xf32>
    %c0_3 = arith.constant 0 : index
    %c0_4 = arith.constant 0 : index
    %3 = vector.load %arg4[%c0_3, %c0_4] : memref<1x128xf32, #tpu.memory_space<vmem>>, vector<1x128xf32>
    %4 = vector.broadcast %3 : vector<1x128xf32> to vector<32x128xf32>
    %5 = arith.addf %2, %4 : vector<32x128xf32>
    %6 = arith.mulf %5, %5 : vector<32x128xf32>
    %7 = arith.mulf %6, %5 : vector<32x128xf32>
    %cst_5 = arith.constant 4.471500e-02 : f32
    %8 = vector.broadcast %cst_5 : f32 to vector<32x128xf32>
    %9 = arith.mulf %8, %7 : vector<32x128xf32>
    %10 = arith.addf %5, %9 : vector<32x128xf32>
    %cst_6 = arith.constant 0.797884583 : f32
    %11 = vector.broadcast %cst_6 : f32 to vector<32x128xf32>
    %12 = arith.mulf %11, %10 : vector<32x128xf32>
    %cst_7 = arith.constant 5.000000e-01 : f32
    %13 = vector.broadcast %cst_7 : f32 to vector<32x128xf32>
    %14 = arith.mulf %13, %5 : vector<32x128xf32>
    %15 = math.tanh %12 : vector<32x128xf32>
    %cst_8 = arith.constant 1.000000e+00 : f32
    %16 = vector.broadcast %cst_8 : f32 to vector<32x128xf32>
    %17 = arith.addf %16, %15 : vector<32x128xf32>
    %18 = arith.mulf %14, %17 : vector<32x128xf32>
    %c0_9 = arith.constant 0 : index
    %c0_10 = arith.constant 0 : index
    %19 = vector.load %arg5[%c0_9, %c0_10] : memref<32x128xf32, #tpu.memory_space<vmem>>, vector<32x128xf32>
    tpu.vector_store %arg5[%c0_9, %c0_10], %18 {strides = array<i32>} : memref<32x128xf32, #tpu.memory_space<vmem>>, vector<32x128xf32>,
    return
  }
  func.func @transform_0(%arg0: i32, %arg1: i32) -> (i32, i32) {
    %c0_i32 = arith.constant 0 : i32
    %c0_i32_0 = arith.constant 0 : i32
    return %arg1, %c0_i32 : i32, i32
  }
  func.func @transform_1(%arg0: i32, %arg1: i32) -> (i32, i32) {
    %c0_i32 = arith.constant 0 : i32
    %c0_i32_0 = arith.constant 0 : i32
    return %c0_i32, %arg0 : i32, i32
  }
  func.func @transform_2(%arg0: i32, %arg1: i32) -> (i32, i32) {
    %c0_i32 = arith.constant 0 : i32
    %c0_i32_0 = arith.constant 0 : i32
    return %c0_i32, %arg0 : i32, i32
  }
  func.func @transform_3(%arg0: i32, %arg1: i32) -> (i32, i32) {
    %c0_i32 = arith.constant 0 : i32
    return %arg1, %arg0 : i32, i32
  }
}

</mosaic_0001>

<bundles_post_ra>
// kernel: mlp_forward.1
= control target key start
LH: loop header
LB: loop body
LE: loop exit
PB: predicated region body
PF: predicated region fallthrough
CT: control target
= control target key end

     0   :  { %8 = vsyncpa [#allocation3], 0  ;;  %s309_s12 = smov [#allocation2]   ;;  %s362_s0 = inlined_call_operand.vmem [shape: f32[32,128], index: 0, kind: input, shape index: {}]   ;;  %s363_s1 = inlined_call_operand.hbm [shape: f32[128,128], index: 1, kind: input, shape index: {}]   ;;  %s364_s2 = inlined_call_operand.vmem [shape: f32[1,128], index: 2, kind: input, shape index: {}]   ;;  %s365_s3 = inlined_call_operand.vmem [shape: f32[32,128], index: 3, kind: output, shape index: {}]  }
   0x1   :  { %s16_s13 = sshll.u32 %s309_s12, 4  ;;  %s17_s13 = int_to_ptr.vmem [resolvable:$true] %s16_s13 }
   0x2   :  { %s295_s14 = scalar_lea.vmem %s17_s13, 2048  ;;  %p300_p1 = scmp.lt.s32.totalorder %s17_s13, %s17_s13 }
   0x3   :  { %p296_p0 = scmp.ne.s32.totalorder %s17_s13, %s295_s14  ;;  %p301_p2 = scmp.lt.s32.totalorder %s295_s14, %s295_s14 }
   0x5   :  { %p302_p3 = por %p301_p2, %p300_p1 }
   0x7   :  { %p303_p4 = pnand %p302_p3, %p296_p0 }
   0x9   :  { %306 = shalt.err (!%p303_p4)
}
   0xa   :  { %s310_s15 = smov 128   ;;  %s311_s16 = smov 8  }
   0xb   :  { %22 = dma.hbm_to_vmem [thread:$0]  %s363_s1, 2048, %s17_s13, [#allocation3], %s310_s15, %s310_s15, %s311_s16  }
   0xc   :  { %307 = dma.done.wait [#allocation3], 2048  }
   0xd   :  { %308 = vsyncadd [#allocation3], 4294965248  ;;  %v47_v0 = vld [vmem:[#allocation2 + $0x78] sm:$0xff]  ;;  %v46_v1 = vld [vmem:[#allocation2 + $0x70] sm:$0xff] }
   0xe   :  { %206 = vmatprep.subr.mxu0 %v47_v0  ;;  %244 = vmatprep.subr.mxu1 %v47_v0  ;;  %v45_v2 = vld [vmem:[#allocation2 + $0x68] sm:$0xff]  ;;  %v44_v3 = vld [vmem:[#allocation2 + $0x60] sm:$0xff]  ;;  %v43_v4 = vld [vmem:[#allocation2 + $0x58] sm:$0xff] }
   0xf   :  { %207 = vmatpush3.msra.mxu0 %v47_v0  ;;  %260 = vmatpush3.msra.mxu1 %v47_v0  ;;  %v42_v5 = vld [vmem:[#allocation2 + $0x50] sm:$0xff]  ;;  %v41_v6 = vld [vmem:[#allocation2 + $0x48] sm:$0xff]  ;;  %v40_v7 = vld [vmem:[#allocation2 + $0x40] sm:$0xff] }
  0x10   :  { %208 = vmatprep.subr.mxu0 %v46_v1  ;;  %245 = vmatprep.subr.mxu1 %v46_v1  ;;  %v39_v8 = vld [vmem:[#allocation2 + $0x38] sm:$0xff]  ;;  %v38_v9 = vld [vmem:[#allocation2 + $0x30] sm:$0xff]  ;;  %v37_v10 = vld [vmem:[#allocation2 + $0x28] sm:$0xff] }
  0x11   :  { %209 = vmatpush3.msra.mxu0 %v46_v1  ;;  %261 = vmatpush3.msra.mxu1 %v46_v1  ;;  %v36_v11 = vld [vmem:[#allocation2 + $0x20] sm:$0xff]  ;;  %v35_v12 = vld [vmem:[#allocation2 + $0x18] sm:$0xff]  ;;  %v34_v13 = vld [vmem:[#allocation2 + $0x10] sm:$0xff] }
  0x12   :  { %210 = vmatprep.subr.mxu0 %v45_v2  ;;  %246 = vmatprep.subr.mxu1 %v45_v2  ;;  %v33_v14 = vld [vmem:[#allocation2 + $0x8] sm:$0xff]  ;;  %v32_v15 = vld [vmem:[#allocation2] sm:$0xff]  ;;  %v30_v17 = vld [vmem:[%s362_s0 + $0x10] sm:$0xff] }
  0x13   :  { %211 = vmatpush3.msra.mxu0 %v45_v2  ;;  %262 = vmatpush3.msra.mxu1 %v45_v2  ;;  %v28_v16 = vld [vmem:[%s362_s0] sm:$0xff]  ;;  %v29_v18 = vld [vmem:[%s362_s0 + $0x8] sm:$0xff]  ;;  %v31_v19 = vld [vmem:[%s362_s0 + $0x18] sm:$0xff] }
  0x14   :  { %212 = vmatprep.subr.mxu0 %v44_v3  ;;  %247 = vmatprep.subr.mxu1 %v44_v3  ;;  %v185_v20 = vld [vmem:[%s364_s2] ss:$0 sm:$0xff] }
  0x15   :  { %213 = vmatpush3.msra.mxu0 %v44_v3  ;;  %263 = vmatpush3.msra.mxu1 %v44_v3 }
  0x16   :  { %214 = vmatprep.subr.mxu0 %v43_v4  ;;  %248 = vmatprep.subr.mxu1 %v43_v4 }
  0x17   :  { %215 = vmatpush3.msra.mxu0 %v43_v4  ;;  %264 = vmatpush3.msra.mxu1 %v43_v4 }
  0x18   :  { %216 = vmatprep.subr.mxu0 %v42_v5  ;;  %249 = vmatprep.subr.mxu1 %v42_v5 }
  0x19   :  { %217 = vmatpush3.msra.mxu0 %v42_v5  ;;  %265 = vmatpush3.msra.mxu1 %v42_v5 }
  0x1a   :  { %218 = vmatprep.subr.mxu0 %v41_v6  ;;  %250 = vmatprep.subr.mxu1 %v41_v6 }
  0x1b   :  { %219 = vmatpush3.msra.mxu0 %v41_v6  ;;  %266 = vmatpush3.msra.mxu1 %v41_v6 }
  0x1c   :  { %220 = vmatprep.subr.mxu0 %v40_v7  ;;  %251 = vmatprep.subr.mxu1 %v40_v7 }
  0x1d   :  { %221 = vmatpush3.msra.mxu0 %v40_v7  ;;  %267 = vmatpush3.msra.mxu1 %v40_v7 }
  0x1e   :  { %222 = vmatprep.subr.mxu0 %v39_v8  ;;  %252 = vmatprep.subr.mxu1 %v39_v8 }
  0x1f   :  { %223 = vmatpush3.msra.mxu0 %v39_v8  ;;  %268 = vmatpush3.msra.mxu1 %v39_v8 }
  0x20   :  { %224 = vmatprep.subr.mxu0 %v38_v9  ;;  %253 = vmatprep.subr.mxu1 %v38_v9 }
  0x21   :  { %225 = vmatpush3.msra.mxu0 %v38_v9  ;;  %269 = vmatpush3.msra.mxu1 %v38_v9 }
  0x22   :  { %226 = vmatprep.subr.mxu0 %v37_v10  ;;  %254 = vmatprep.subr.mxu1 %v37_v10 }
  0x23   :  { %227 = vmatpush3.msra.mxu0 %v37_v10  ;;  %270 = vmatpush3.msra.mxu1 %v37_v10 }
  0x24   :  { %228 = vmatprep.subr.mxu0 %v36_v11  ;;  %255 = vmatprep.subr.mxu1 %v36_v11 }
  0x25   :  { %229 = vmatpush3.msra.mxu0 %v36_v11  ;;  %271 = vmatpush3.msra.mxu1 %v36_v11 }
  0x26   :  { %230 = vmatprep.subr.mxu0 %v35_v12  ;;  %256 = vmatprep.subr.mxu1 %v35_v12 }
  0x27   :  { %231 = vmatpush3.msra.mxu0 %v35_v12  ;;  %272 = vmatpush3.msra.mxu1 %v35_v12 }
  0x28   :  { %232 = vmatprep.subr.mxu0 %v34_v13  ;;  %257 = vmatprep.subr.mxu1 %v34_v13 }
  0x29   :  { %233 = vmatpush3.msra.mxu0 %v34_v13  ;;  %273 = vmatpush3.msra.mxu1 %v34_v13 }
  0x2a   :  { %234 = vmatprep.subr.mxu0 %v33_v14  ;;  %258 = vmatprep.subr.mxu1 %v33_v14 }
  0x2b   :  { %235 = vmatpush3.msra.mxu0 %v33_v14  ;;  %274 = vmatpush3.msra.mxu1 %v33_v14 }
  0x2c   :  { %236 = vmatprep.subr.mxu0 %v32_v15  ;;  %259 = vmatprep.subr.mxu1 %v32_v15 }
  0x2d   :  { %237 = vmatpush3.msra.mxu0 %v32_v15  ;;  %275 = vmatpush3.msra.mxu1 %v32_v15 }
  0x2e   :  { %238 = vmatprep.mubr.f32.mxu0 %v28_v16  ;;  %241 = vmatprep.mubr.f32.mxu1 %v30_v17 }
  0x2f   :  { %239 = vmatmul.mubr.f32.vlgmr.msra.gmra.mxu0 %v29_v18  ;;  %242 = vmatmul.mubr.f32.vlgmr.msra.gmra.mxu1 %v31_v19 }
  0xef   :  { %v240_v21 = vpop.f32.mrf.mxu0  ;;  %v243_v22 = vpop.f32.mrf.mxu1 }
  0xf0   :  { %v127_v23 = vadd.f32 %v240_v21, %v185_v20  ;;  %v137_v24 = vadd.f32 %v243_v22, %v185_v20 }
  0xf1   :  { %v121_v25 = vpop.f32.mrf.mxu0  ;;  %v131_v26 = vpop.f32.mrf.mxu1 }
  0xf2   :  { %v141_v27 = vmul.f32 %v127_v23, %v127_v23  ;;  %v143_v28 = vmul.f32 %v137_v24, %v137_v24  ;;  %v122_v29 = vadd.f32 %v185_v20, %v121_v25  ;;  %v132_v30 = vadd.f32 %v185_v20, %v131_v26 }
  0xf3   :  { %v161_v51 = vmul.f32 0.5, %v127_v23  ;;  %v163_v53 = vmul.f32 0.5, %v137_v24 }
  0xf4   :  { %v145_v31 = vmul.f32 %v141_v27, %v127_v23  ;;  %v147_v32 = vmul.f32 %v143_v28, %v137_v24  ;;  %v140_v33 = vmul.f32 %v122_v29, %v122_v29  ;;  %v142_v34 = vmul.f32 %v132_v30, %v132_v30 }
  0xf5   :  { %v160_v59 = vmul.f32 0.5, %v122_v29  ;;  %v162_v61 = vmul.f32 0.5, %v132_v30 }
  0xf6   :  { %v149_v35 = vmul.f32 0.044715, %v145_v31  ;;  %v151_v36 = vmul.f32 0.044715, %v147_v32  ;;  %v144_v37 = vmul.f32 %v140_v33, %v122_v29  ;;  %v146_v38 = vmul.f32 %v142_v34, %v132_v30 }
  0xf8   :  { %v153_v39 = vadd.f32 %v149_v35, %v127_v23  ;;  %v155_v40 = vadd.f32 %v151_v36, %v137_v24  ;;  %v148_v41 = vmul.f32 0.044715, %v144_v37  ;;  %v150_v42 = vmul.f32 0.044715, %v146_v38 }
  0xfa   :  { %v157_v43 = vmul.f32 0.7978846, %v153_v39  ;;  %v159_v44 = vmul.f32 0.7978846, %v155_v40  ;;  %v152_v45 = vadd.f32 %v148_v41, %v122_v29  ;;  %v154_v46 = vadd.f32 %v150_v42, %v132_v30 }
  0xfc   :  { %279 = vtanh.f32 %v157_v43  ;;  %v156_v47 = vmul.f32 0.7978846, %v152_v45  ;;  %v158_v48 = vmul.f32 0.7978846, %v154_v46 }
  0xfd   :  { %281 = vtanh.f32 %v159_v44 }
  0xfe   :  { %283 = vtanh.f32 %v156_v47 }
  0xff   :  { %285 = vtanh.f32 %v158_v48 }
 0x109   :  { %v280_v49 = vpop.eup %279 }
 0x10a   :  { %v282_v50 = vpop.eup %281  ;;  %v169_v52 = vadd.f32 1.0, %v280_v49 }
 0x10b   :  { %v171_v54 = vadd.f32 1.0, %v282_v50  ;;  %v284_v55 = vpop.eup %283 }
 0x10c   :  { %v173_v56 = vmul.f32 %v169_v52, %v161_v51  ;;  %v286_v57 = vpop.eup %285  ;;  %v168_v60 = vadd.f32 1.0, %v284_v55 }
 0x10d   :  { %v175_v58 = vmul.f32 %v171_v54, %v163_v53  ;;  %v170_v62 = vadd.f32 1.0, %v286_v57 }
 0x10e   :  { %177 = vst [vmem:[%s365_s3 + $0x8] sm:$0xff] %v173_v56  ;;  %v172_v63 = vmul.f32 %v168_v60, %v160_v59 }
 0x10f   :  { %179 = vst [vmem:[%s365_s3 + $0x18] sm:$0xff] %v175_v58  ;;  %v174_v0 = vmul.f32 %v170_v62, %v162_v61 }
 0x110   :  { %176 = vst [vmem:[%s365_s3] sm:$0xff] %v172_v63 }
 0x111   :  { %178 = vst [vmem:[%s365_s3 + $0x10] sm:$0xff] %v174_v0 }
 0x112   :  { %184 = vsyncpa [#allocation3], 1 }

</bundles_post_ra>
